<compile_context>
chip_gen: v7x
topology: tpu7x:2x2x1
jax: 0.10.0
libtpu: 0.0.40
codegen_flags: <defaults>
</compile_context>

<pallas_src>
import jax
import jax.numpy as jnp
from jax.experimental import pallas as pl
from jax.experimental.pallas import tpu as pltpu

DEPTH = 4                     # Conv1d in_channels and kernel_size
HIDDEN1, HIDDEN2, HIDDEN3 = 20, 10, 5


def _round_up(n, m):
    return ((n + m - 1) // m) * m


def _build_conv_matrix(conv_w, L):
    """Banded matrix W so that x.reshape(B, L*C) @ W == Conv1d(x_ncw, padding=1)."""
    _, C, K = conv_w.shape                       # (1, 4, 4)
    L_out = L + 2 - K + 1                        # padding=1 -> L - 1 for K=4
    w = conv_w.reshape(C, K).astype(jnp.float32)
    l = jnp.arange(L)[:, None, None]             # (L, 1, 1)
    k = jnp.arange(K)[None, :, None]             # (1, K, 1)
    o = jnp.arange(L_out)[None, None, :]         # (1, 1, L_out)
    # conv[b, o] = sum_{c,k} w[c,k] * x[b, o+k-1, c]; zero padding handled
    # automatically because l only ranges over [0, L).
    sel = (l == o + k - 1).astype(jnp.float32)   # (L, K, L_out)
    Wc = jnp.einsum('ck,lko->lco', w, sel)       # (L, C, L_out)
    return Wc.reshape(L * C, L_out)


def _nn_exp_kernel(sc_ref, x_ref, wc_ref, w1_ref, b1_ref, w2_ref, b2_ref,
                   w3_ref, b3_ref, w4_ref, b4_ref, wea_ref, web_ref,
                   logit_ref, lamb_ref):
    # sc_ref : SMEM (2,)  -> [conv bias, exp bias]
    # x_ref  : (TILE_B, L*C) natural NWC layout
    # wc_ref : (L*C, L_out) banded conv matrix
    # w*_ref : pre-transposed linear weights, b*_ref : (1, N) bias rows
    f32 = jnp.float32
    x = x_ref[...]

    # Conv1d (banded matmul) + bias + ReLU -> (TILE_B, L_out)
    conv = jnp.dot(x, wc_ref[...], preferred_element_type=f32) + sc_ref[0]
    h = jnp.maximum(conv, 0.0)

    # layer1 (no activation in the PyTorch forward)
    out1 = jnp.dot(h.astype(w1_ref.dtype), w1_ref[...],
                   preferred_element_type=f32) + b1_ref[...]
    # layer2 + ReLU
    out2 = jnp.maximum(
        jnp.dot(out1.astype(w2_ref.dtype), w2_ref[...],
                preferred_element_type=f32) + b2_ref[...], 0.0)
    # layer3 + ReLU
    out3 = jnp.maximum(
        jnp.dot(out2.astype(w3_ref.dtype), w3_ref[...],
                preferred_element_type=f32) + b3_ref[...], 0.0)
    # layer4 + ReLU -> logit
    logit = jnp.maximum(
        jnp.dot(out3.astype(w4_ref.dtype), w4_ref[...],
                preferred_element_type=f32) + b4_ref[...], 0.0)

    # exp head: Linear(cat(out3, logit)) done as two matmuls (no concat)
    z = (jnp.dot(out3.astype(wea_ref.dtype), wea_ref[...],
                 preferred_element_type=f32)
         + jnp.dot(logit.astype(web_ref.dtype), web_ref[...],
                   preferred_element_type=f32)
         + sc_ref[1])
    # numerically stable softplus (matches torch.nn.Softplus within f32 eps)
    lamb = jnp.maximum(z, 0.0) + jnp.log1p(jnp.exp(-jnp.abs(z)))

    logit_ref[...] = logit.astype(logit_ref.dtype)
    lamb_ref[...] = lamb.astype(lamb_ref.dtype)


def neural_network_exponential_forward(x, params, *, compute_dtype=jnp.float32,
                                       tile_b=None):
    """x: (B, L, DEPTH). Returns (logit (B, model_output), lamb (B, 1))."""
    conv_w, conv_b = params['conv_w'], params['conv_b']
    w1, b1 = params['w1'], params['b1']
    w2, b2 = params['w2'], params['b2']
    w3, b3 = params['w3'], params['b3']
    w4, b4 = params['w4'], params['b4']
    we, be = params['we'], params['be']

    B, L, C = x.shape
    assert C == DEPTH and conv_w.shape == (1, DEPTH, DEPTH)
    L_out = L - 1                                   # conv output length (padding=1)
    model_output = w4.shape[0]
    assert w1.shape == (HIDDEN1, L_out)
    assert we.shape == (1, HIDDEN3 + model_output)

    # --- weight prep (tiny, wrapper-side) ---
    wc = _build_conv_matrix(conv_w, L).astype(compute_dtype)   # (L*C, L_out)
    w1t = w1.T.astype(compute_dtype)                           # (L_out, 20)
    w2t = w2.T.astype(compute_dtype)                           # (20, 10)
    w3t = w3.T.astype(compute_dtype)                           # (10, 5)
    w4t = w4.T.astype(compute_dtype)                           # (5, model_output)
    wea = we[:, :HIDDEN3].T.astype(compute_dtype)              # (5, 1)
    web = we[:, HIDDEN3:].T.astype(compute_dtype)              # (model_output, 1)
    b1r = b1.reshape(1, HIDDEN1).astype(jnp.float32)
    b2r = b2.reshape(1, HIDDEN2).astype(jnp.float32)
    b3r = b3.reshape(1, HIDDEN3).astype(jnp.float32)
    b4r = b4.reshape(1, model_output).astype(jnp.float32)
    scalars = jnp.stack([conv_b.reshape(()), be.reshape(())]).astype(jnp.float32)

    # --- batch tiling: natural NWC layout, no transpose/pad over the data ---
    LC = L * C
    x_flat = x.reshape(B, LC).astype(compute_dtype)
    if tile_b is None:
        tile_b = min(512, _round_up(B, 8))          # multiple of 8 sublanes
    B_pad = _round_up(B, tile_b)
    if B_pad != B:
        x_flat = jnp.pad(x_flat, ((0, B_pad - B), (0, 0)))
    grid = (B_pad // tile_b,)

    def const(shape):                               # VMEM-resident weight blocks
        return pl.BlockSpec(shape, lambda i: (0, 0))

    logit_pad, lamb_pad = pl.pallas_call(
        _nn_exp_kernel,
        out_shape=(jax.ShapeDtypeStruct((B_pad, model_output), jnp.float32),
                   jax.ShapeDtypeStruct((B_pad, 1), jnp.float32)),
        grid=grid,
        in_specs=[
            pl.BlockSpec(memory_space=pltpu.MemorySpace.SMEM),     # scalar biases
            pl.BlockSpec((tile_b, LC), lambda i: (i, 0)),          # x tile
            const((LC, L_out)),
            const((L_out, HIDDEN1)), const((1, HIDDEN1)),
            const((HIDDEN1, HIDDEN2)), const((1, HIDDEN2)),
            const((HIDDEN2, HIDDEN3)), const((1, HIDDEN3)),
            const((HIDDEN3, model_output)), const((1, model_output)),
            const((HIDDEN3, 1)), const((model_output, 1)),
        ],
        out_specs=(pl.BlockSpec((tile_b, model_output), lambda i: (i, 0)),
                   pl.BlockSpec((tile_b, 1), lambda i: (i, 0))),
        compiler_params=pltpu.CompilerParams(
            dimension_semantics=("parallel",)),     # shards batch across TCs on v7x
    )(scalars, x_flat, wc, w1t, b1r, w2t, b2r, w3t, b3r, w4t, b4r, wea, web)

    return logit_pad[:B], lamb_pad[:B]


def _reference(x, params):
    """Pure-JAX reference matching the PyTorch NeuralNetworkExponential.forward."""
    conv_w, conv_b = params['conv_w'], params['conv_b']
    xp = jnp.transpose(x, (0, 2, 1))                       # (B, C, L)
    xp = jnp.pad(xp, ((0, 0), (0, 0), (1, 1)))             # Conv1d padding=1
    B, C, Lp = xp.shape
    K = conv_w.shape[2]
    L_out = Lp - K + 1
    w = conv_w.reshape(C, K)
    conv = jnp.zeros((B, L_out), jnp.float32)
    for k in range(K):
        conv = conv + jnp.sum(xp[:, :, k:k + L_out] * w[None, :, k:k + 1], axis=1)
    h = jnp.maximum(conv + conv_b[0], 0.0)
    out1 = h @ params['w1'].T + params['b1']
    out2 = jax.nn.relu(out1 @ params['w2'].T + params['b2'])
    out3 = jax.nn.relu(out2 @ params['w3'].T + params['b3'])
    logit = jax.nn.relu(out3 @ params['w4'].T + params['b4'])
    lamb = jax.nn.softplus(
        jnp.concatenate([out3, logit], axis=1) @ params['we'].T + params['be'])
    return logit, lamb


if __name__ == "__main__":
    B, L = 2, 16
    model_input = L - 1          # flatten size after Conv1d = 15
    model_output = 3

    key = jax.random.PRNGKey(0)
    ks = jax.random.split(key, 13)
    x = jax.random.normal(ks[0], (B, L, DEPTH), dtype=jnp.float32)
    params = dict(
        conv_w=0.1 * jax.random.normal(ks[1], (1, DEPTH, DEPTH), jnp.float32),
        conv_b=0.1 * jax.random.normal(ks[2], (1,), jnp.float32),
        w1=0.1 * jax.random.normal(ks[3], (HIDDEN1, model_input), jnp.float32),
        b1=0.1 * jax.random.normal(ks[4], (HIDDEN1,), jnp.float32),
        w2=0.1 * jax.random.normal(ks[5], (HIDDEN2, HIDDEN1), jnp.float32),
        b2=0.1 * jax.random.normal(ks[6], (HIDDEN2,), jnp.float32),
        w3=0.1 * jax.random.normal(ks[7], (HIDDEN3, HIDDEN2), jnp.float32),
        b3=0.1 * jax.random.normal(ks[8], (HIDDEN3,), jnp.float32),
        w4=0.1 * jax.random.normal(ks[9], (model_output, HIDDEN3), jnp.float32),
        b4=0.1 * jax.random.normal(ks[10], (model_output,), jnp.float32),
        we=0.1 * jax.random.normal(ks[11], (1, HIDDEN3 + model_output), jnp.float32),
        be=0.1 * jax.random.normal(ks[12], (1,), jnp.float32),
    )

    fwd = jax.jit(neural_network_exponential_forward)
    logit, lamb = fwd(x, params)
    logit, lamb = jax.block_until_ready((logit, lamb))

    ref_logit, ref_lamb = _reference(x, params)
    assert logit.shape == (B, model_output) and lamb.shape == (B, 1)
    assert jnp.allclose(logit, ref_logit, atol=1e-5, rtol=1e-5), "logit mismatch"
    assert jnp.allclose(lamb, ref_lamb, atol=1e-5, rtol=1e-5), "lamb mismatch"

    print("KERNEL_OK")
</pallas_src>

<mosaic_0001>
module attributes {stable_mosaic.version = 11 : i64} {
  func.func @_nn_exp_kernel(%arg0: i32, %arg1: memref<2xf32, #tpu.memory_space<smem>>, %arg2: memref<8x64xf32, #tpu.memory_space<vmem>>, %arg3: memref<64x15xf32, #tpu.memory_space<vmem>>, %arg4: memref<15x20xf32, #tpu.memory_space<vmem>>, %arg5: memref<1x20xf32, #tpu.memory_space<vmem>>, %arg6: memref<20x10xf32, #tpu.memory_space<vmem>>, %arg7: memref<1x10xf32, #tpu.memory_space<vmem>>, %arg8: memref<10x5xf32, #tpu.memory_space<vmem>>, %arg9: memref<1x5xf32, #tpu.memory_space<vmem>>, %arg10: memref<5x3xf32, #tpu.memory_space<vmem>>, %arg11: memref<1x3xf32, #tpu.memory_space<vmem>>, %arg12: memref<5x1xf32, #tpu.memory_space<vmem>>, %arg13: memref<3x1xf32, #tpu.memory_space<vmem>>, %arg14: memref<8x3xf32, #tpu.memory_space<vmem>>, %arg15: memref<8x1xf32, #tpu.memory_space<vmem>>) attributes {dimension_semantics = [#tpu.dimension_semantics<parallel>], iteration_bounds = array<i64: 1>, scalar_prefetch = 0 : i64, scratch_operands = 0 : i64, tpu.core_type = #tpu.core_type<tc>, window_params = [{transform_indices = @transform_0, window_bounds = array<i64: 2>}, {transform_indices = @transform_1, window_bounds = array<i64: 8, 64>}, {pipeline_mode = #tpu.pipeline_mode<synchronous>, transform_indices = @transform_2, window_bounds = array<i64: 64, 15>}, {pipeline_mode = #tpu.pipeline_mode<synchronous>, transform_indices = @transform_3, window_bounds = array<i64: 15, 20>}, {pipeline_mode = #tpu.pipeline_mode<synchronous>, transform_indices = @transform_4, window_bounds = array<i64: 1, 20>}, {pipeline_mode = #tpu.pipeline_mode<synchronous>, transform_indices = @transform_5, window_bounds = array<i64: 20, 10>}, {pipeline_mode = #tpu.pipeline_mode<synchronous>, transform_indices = @transform_6, window_bounds = array<i64: 1, 10>}, {pipeline_mode = #tpu.pipeline_mode<synchronous>, transform_indices = @transform_7, window_bounds = array<i64: 10, 5>}, {pipeline_mode = #tpu.pipeline_mode<synchronous>, transform_indices = @transform_8, window_bounds = array<i64: 1, 5>}, {pipeline_mode = #tpu.pipeline_mode<synchronous>, transform_indices = @transform_9, window_bounds = array<i64: 5, 3>}, {pipeline_mode = #tpu.pipeline_mode<synchronous>, transform_indices = @transform_10, window_bounds = array<i64: 1, 3>}, {pipeline_mode = #tpu.pipeline_mode<synchronous>, transform_indices = @transform_11, window_bounds = array<i64: 5, 1>}, {pipeline_mode = #tpu.pipeline_mode<synchronous>, transform_indices = @transform_12, window_bounds = array<i64: 3, 1>}, {transform_indices = @transform_13, window_bounds = array<i64: 8, 3>}, {transform_indices = @transform_14, window_bounds = array<i64: 8, 1>}]} {
    %c0 = arith.constant 0 : index
    %c0_0 = arith.constant 0 : index
    %0 = vector.load %arg2[%c0, %c0_0] : memref<8x64xf32, #tpu.memory_space<vmem>>, vector<8x64xf32>
    %c0_1 = arith.constant 0 : index
    %c0_2 = arith.constant 0 : index
    %1 = vector.load %arg3[%c0_1, %c0_2] : memref<64x15xf32, #tpu.memory_space<vmem>>, vector<64x15xf32>
    %cst = arith.constant dense<0.000000e+00> : vector<8x15xf32>
    %2 = tpu.matmul %0, %1, %cst {dimension_numbers = #tpu.dot_dimension_numbers<[1], [0], [0], [1], [0, 0, 1, 1], [], []>} : vector<8x64xf32>, vector<64x15xf32>, vector<8x15xf32> -> vector<8x15xf32>
    %c0_3 = arith.constant 0 : index
    %3 = memref.load %arg1[%c0_3] : memref<2xf32, #tpu.memory_space<smem>>
    %4 = vector.broadcast %3 : f32 to vector<8x15xf32>
    %5 = arith.addf %2, %4 : vector<8x15xf32>
    %cst_4 = arith.constant 0.000000e+00 : f32
    %6 = vector.broadcast %cst_4 : f32 to vector<8x15xf32>
    %7 = arith.maximumf %5, %6 : vector<8x15xf32>
    %c0_5 = arith.constant 0 : index
    %c0_6 = arith.constant 0 : index
    %8 = vector.load %arg4[%c0_5, %c0_6] : memref<15x20xf32, #tpu.memory_space<vmem>>, vector<15x20xf32>
    %cst_7 = arith.constant dense<0.000000e+00> : vector<8x20xf32>
    %9 = tpu.matmul %7, %8, %cst_7 {dimension_numbers = #tpu.dot_dimension_numbers<[1], [0], [0], [1], [0, 0, 1, 1], [], []>} : vector<8x15xf32>, vector<15x20xf32>, vector<8x20xf32> -> vector<8x20xf32>
    %c0_8 = arith.constant 0 : index
    %c0_9 = arith.constant 0 : index
    %10 = vector.load %arg5[%c0_8, %c0_9] : memref<1x20xf32, #tpu.memory_space<vmem>>, vector<1x20xf32>
    %11 = vector.broadcast %10 : vector<1x20xf32> to vector<8x20xf32>
    %12 = arith.addf %9, %11 : vector<8x20xf32>
    %c0_10 = arith.constant 0 : index
    %c0_11 = arith.constant 0 : index
    %13 = vector.load %arg6[%c0_10, %c0_11] : memref<20x10xf32, #tpu.memory_space<vmem>>, vector<20x10xf32>
    %cst_12 = arith.constant dense<0.000000e+00> : vector<8x10xf32>
    %14 = tpu.matmul %12, %13, %cst_12 {dimension_numbers = #tpu.dot_dimension_numbers<[1], [0], [0], [1], [0, 0, 1, 1], [], []>} : vector<8x20xf32>, vector<20x10xf32>, vector<8x10xf32> -> vector<8x10xf32>
    %c0_13 = arith.constant 0 : index
    %c0_14 = arith.constant 0 : index
    %15 = vector.load %arg7[%c0_13, %c0_14] : memref<1x10xf32, #tpu.memory_space<vmem>>, vector<1x10xf32>
    %16 = vector.broadcast %15 : vector<1x10xf32> to vector<8x10xf32>
    %17 = arith.addf %14, %16 : vector<8x10xf32>
    %cst_15 = arith.constant 0.000000e+00 : f32
    %18 = vector.broadcast %cst_15 : f32 to vector<8x10xf32>
    %19 = arith.maximumf %17, %18 : vector<8x10xf32>
    %c0_16 = arith.constant 0 : index
    %c0_17 = arith.constant 0 : index
    %20 = vector.load %arg8[%c0_16, %c0_17] : memref<10x5xf32, #tpu.memory_space<vmem>>, vector<10x5xf32>
    %cst_18 = arith.constant dense<0.000000e+00> : vector<8x5xf32>
    %21 = tpu.matmul %19, %20, %cst_18 {dimension_numbers = #tpu.dot_dimension_numbers<[1], [0], [0], [1], [0, 0, 1, 1], [], []>} : vector<8x10xf32>, vector<10x5xf32>, vector<8x5xf32> -> vector<8x5xf32>
    %c0_19 = arith.constant 0 : index
    %c0_20 = arith.constant 0 : index
    %22 = vector.load %arg9[%c0_19, %c0_20] : memref<1x5xf32, #tpu.memory_space<vmem>>, vector<1x5xf32>
    %23 = vector.broadcast %22 : vector<1x5xf32> to vector<8x5xf32>
    %24 = arith.addf %21, %23 : vector<8x5xf32>
    %cst_21 = arith.constant 0.000000e+00 : f32
    %25 = vector.broadcast %cst_21 : f32 to vector<8x5xf32>
    %26 = arith.maximumf %24, %25 : vector<8x5xf32>
    %c0_22 = arith.constant 0 : index
    %c0_23 = arith.constant 0 : index
    %27 = vector.load %arg10[%c0_22, %c0_23] : memref<5x3xf32, #tpu.memory_space<vmem>>, vector<5x3xf32>
    %cst_24 = arith.constant dense<0.000000e+00> : vector<8x3xf32>
    %28 = tpu.matmul %26, %27, %cst_24 {dimension_numbers = #tpu.dot_dimension_numbers<[1], [0], [0], [1], [0, 0, 1, 1], [], []>} : vector<8x5xf32>, vector<5x3xf32>, vector<8x3xf32> -> vector<8x3xf32>
    %c0_25 = arith.constant 0 : index
    %c0_26 = arith.constant 0 : index
    %29 = vector.load %arg11[%c0_25, %c0_26] : memref<1x3xf32, #tpu.memory_space<vmem>>, vector<1x3xf32>
    %30 = vector.broadcast %29 : vector<1x3xf32> to vector<8x3xf32>
    %31 = arith.addf %28, %30 : vector<8x3xf32>
    %cst_27 = arith.constant 0.000000e+00 : f32
    %32 = vector.broadcast %cst_27 : f32 to vector<8x3xf32>
    %33 = arith.maximumf %31, %32 : vector<8x3xf32>
    %c0_28 = arith.constant 0 : index
    %c0_29 = arith.constant 0 : index
    %34 = vector.load %arg12[%c0_28, %c0_29] : memref<5x1xf32, #tpu.memory_space<vmem>>, vector<5x1xf32>
    %cst_30 = arith.constant dense<0.000000e+00> : vector<8x1xf32>
    %35 = tpu.matmul %26, %34, %cst_30 {dimension_numbers = #tpu.dot_dimension_numbers<[1], [0], [0], [1], [0, 0, 1, 1], [], []>} : vector<8x5xf32>, vector<5x1xf32>, vector<8x1xf32> -> vector<8x1xf32>
    %c0_31 = arith.constant 0 : index
    %c0_32 = arith.constant 0 : index
    %36 = vector.load %arg13[%c0_31, %c0_32] : memref<3x1xf32, #tpu.memory_space<vmem>>, vector<3x1xf32>
    %cst_33 = arith.constant dense<0.000000e+00> : vector<8x1xf32>
    %37 = tpu.matmul %33, %36, %cst_33 {dimension_numbers = #tpu.dot_dimension_numbers<[1], [0], [0], [1], [0, 0, 1, 1], [], []>} : vector<8x3xf32>, vector<3x1xf32>, vector<8x1xf32> -> vector<8x1xf32>
    %38 = arith.addf %35, %37 : vector<8x1xf32>
    %c1 = arith.constant 1 : index
    %39 = memref.load %arg1[%c1] : memref<2xf32, #tpu.memory_space<smem>>
    %40 = vector.broadcast %39 : f32 to vector<8x1xf32>
    %41 = arith.addf %38, %40 : vector<8x1xf32>
    %cst_34 = arith.constant 0.000000e+00 : f32
    %42 = vector.broadcast %cst_34 : f32 to vector<8x1xf32>
    %43 = arith.maximumf %41, %42 : vector<8x1xf32>
    %44 = math.absf %41 : vector<8x1xf32>
    %cst_35 = arith.constant 0.000000e+00 : f32
    %45 = vector.broadcast %cst_35 : f32 to vector<8x1xf32>
    %46 = arith.subf %45, %44 : vector<8x1xf32>
    %47 = math.exp %46 : vector<8x1xf32>
    %48 = math.log1p %47 : vector<8x1xf32>
    %49 = arith.addf %43, %48 : vector<8x1xf32>
    %c0_36 = arith.constant 0 : index
    %c0_37 = arith.constant 0 : index
    %50 = vector.load %arg14[%c0_36, %c0_37] : memref<8x3xf32, #tpu.memory_space<vmem>>, vector<8x3xf32>
    tpu.vector_store %arg14[%c0_36, %c0_37], %33 {strides = array<i32>} : memref<8x3xf32, #tpu.memory_space<vmem>>, vector<8x3xf32>,
    %c0_38 = arith.constant 0 : index
    %c0_39 = arith.constant 0 : index
    %51 = vector.load %arg15[%c0_38, %c0_39] : memref<8x1xf32, #tpu.memory_space<vmem>>, vector<8x1xf32>
    tpu.vector_store %arg15[%c0_38, %c0_39], %49 {strides = array<i32>} : memref<8x1xf32, #tpu.memory_space<vmem>>, vector<8x1xf32>,
    return
  }
  func.func @transform_0(%arg0: i32) -> i32 {
    %c0_i32 = arith.constant 0 : i32
    %c0_i32_0 = arith.constant 0 : i32
    return %c0_i32 : i32
  }
  func.func @transform_1(%arg0: i32) -> (i32, i32) {
    %c0_i32 = arith.constant 0 : i32
    %c0_i32_0 = arith.constant 0 : i32
    return %arg0, %c0_i32 : i32, i32
  }
  func.func @transform_2(%arg0: i32) -> (i32, i32) {
    %c0_i32 = arith.constant 0 : i32
    %c0_i32_0 = arith.constant 0 : i32
    %c0_i32_1 = arith.constant 0 : i32
    return %c0_i32, %c0_i32_0 : i32, i32
  }
  func.func @transform_3(%arg0: i32) -> (i32, i32) {
    %c0_i32 = arith.constant 0 : i32
    %c0_i32_0 = arith.constant 0 : i32
    %c0_i32_1 = arith.constant 0 : i32
    return %c0_i32, %c0_i32_0 : i32, i32
  }
  func.func @transform_4(%arg0: i32) -> (i32, i32) {
    %c0_i32 = arith.constant 0 : i32
    %c0_i32_0 = arith.constant 0 : i32
    %c0_i32_1 = arith.constant 0 : i32
    return %c0_i32, %c0_i32_0 : i32, i32
  }
  func.func @transform_5(%arg0: i32) -> (i32, i32) {
    %c0_i32 = arith.constant 0 : i32
    %c0_i32_0 = arith.constant 0 : i32
    %c0_i32_1 = arith.constant 0 : i32
    return %c0_i32, %c0_i32_0 : i32, i32
  }
  func.func @transform_6(%arg0: i32) -> (i32, i32) {
    %c0_i32 = arith.constant 0 : i32
    %c0_i32_0 = arith.constant 0 : i32
    %c0_i32_1 = arith.constant 0 : i32
    return %c0_i32, %c0_i32_0 : i32, i32
  }
  func.func @transform_7(%arg0: i32) -> (i32, i32) {
    %c0_i32 = arith.constant 0 : i32
    %c0_i32_0 = arith.constant 0 : i32
    %c0_i32_1 = arith.constant 0 : i32
    return %c0_i32, %c0_i32_0 : i32, i32
  }
  func.func @transform_8(%arg0: i32) -> (i32, i32) {
    %c0_i32 = arith.constant 0 : i32
    %c0_i32_0 = arith.constant 0 : i32
    %c0_i32_1 = arith.constant 0 : i32
    return %c0_i32, %c0_i32_0 : i32, i32
  }
  func.func @transform_9(%arg0: i32) -> (i32, i32) {
    %c0_i32 = arith.constant 0 : i32
    %c0_i32_0 = arith.constant 0 : i32
    %c0_i32_1 = arith.constant 0 : i32
    return %c0_i32, %c0_i32_0 : i32, i32
  }
  func.func @transform_10(%arg0: i32) -> (i32, i32) {
    %c0_i32 = arith.constant 0 : i32
    %c0_i32_0 = arith.constant 0 : i32
    %c0_i32_1 = arith.constant 0 : i32
    return %c0_i32, %c0_i32_0 : i32, i32
  }
  func.func @transform_11(%arg0: i32) -> (i32, i32) {
    %c0_i32 = arith.constant 0 : i32
    %c0_i32_0 = arith.constant 0 : i32
    %c0_i32_1 = arith.constant 0 : i32
    return %c0_i32, %c0_i32_0 : i32, i32
  }
  func.func @transform_12(%arg0: i32) -> (i32, i32) {
    %c0_i32 = arith.constant 0 : i32
    %c0_i32_0 = arith.constant 0 : i32
    %c0_i32_1 = arith.constant 0 : i32
    return %c0_i32, %c0_i32_0 : i32, i32
  }
  func.func @transform_13(%arg0: i32) -> (i32, i32) {
    %c0_i32 = arith.constant 0 : i32
    %c0_i32_0 = arith.constant 0 : i32
    return %arg0, %c0_i32 : i32, i32
  }
  func.func @transform_14(%arg0: i32) -> (i32, i32) {
    %c0_i32 = arith.constant 0 : i32
    %c0_i32_0 = arith.constant 0 : i32
    return %arg0, %c0_i32 : i32, i32
  }
}

</mosaic_0001>

<bundles_post_ra>
// kernel: neural_network_exponential_forward.1
= control target key start
LH: loop header
LB: loop body
LE: loop exit
PB: predicated region body
PF: predicated region fallthrough
CT: control target
= control target key end

     0   :  { %20 = vsyncpa [#allocation3], 0  ;;  %s1003_s0 = inlined_call_operand.vmem [shape: f32[2], index: 0, kind: input, shape index: {}]   ;;  %s1004_s1 = inlined_call_operand.vmem [shape: f32[8,64], index: 1, kind: input, shape index: {}]   ;;  %s1005_s2 = inlined_call_operand.vmem [shape: f32[64,15], index: 2, kind: input, shape index: {}]   ;;  %s1006_s3 = inlined_call_operand.vmem [shape: f32[15,20], index: 3, kind: input, shape index: {}]   ;;  %s1007_s4 = inlined_call_operand.vmem [shape: f32[1,20], index: 4, kind: input, shape index: {}]   ;;  %s1008_s5 = inlined_call_operand.vmem [shape: f32[20,10], index: 5, kind: input, shape index: {}]   ;;  %s1009_s6 = inlined_call_operand.vmem [shape: f32[1,10], index: 6, kind: input, shape index: {}]   ;;  %s1010_s7 = inlined_call_operand.vmem [shape: f32[10,5], index: 7, kind: input, shape index: {}]   ;;  %s1011_s8 = inlined_call_operand.vmem [shape: f32[1,5], index: 8, kind: input, shape index: {}]   ;;  %s1012_s9 = inlined_call_operand.vmem [shape: f32[5,3], index: 9, kind: input, shape index: {}]   ;;  %s1013_s10 = inlined_call_operand.vmem [shape: f32[1,3], index: 10, kind: input, shape index: {}]   ;;  %s1014_s11 = inlined_call_operand.vmem [shape: f32[5,1], index: 11, kind: input, shape index: {}]   ;;  %s1015_s12 = inlined_call_operand.vmem [shape: f32[3,1], index: 12, kind: input, shape index: {}]   ;;  %s1016_s13 = inlined_call_operand.vmem [shape: f32[8,3], index: 13, kind: output, shape index: {0}]   ;;  %s1017_s14 = inlined_call_operand.vmem [shape: f32[8,1], index: 14, kind: output, shape index: {1}]  }
   0x1   :  { %s27_s15 = sshll.u32 %s1003_s0, 4  ;;  %s28_s15 = int_to_ptr.vmem [resolvable:$true] %s27_s15 }
   0x2   :  { %s811_s16 = scalar_lea.vmem %s28_s15, 16  ;;  %p816_p1 = scmp.lt.s32.totalorder %s28_s15, %s28_s15 }
   0x3   :  { %p812_p0 = scmp.ne.s32.totalorder %s28_s15, %s811_s16  ;;  %p817_p2 = scmp.lt.s32.totalorder %s811_s16, %s811_s16 }
   0x5   :  { %p818_p3 = por %p817_p2, %p816_p1 }
   0x7   :  { %p819_p4 = pnand %p818_p3, %p812_p0 }
   0x9   :  { %822 = shalt.err (!%p819_p4)
}
   0xa   :  { %s825_s17 = smov [#allocation2]  }
   0xb   :  { %30 = dma.vmem_to_smem %s28_s15, 16, %s825_s17, [#allocation3]  }
   0xc   :  { %823 = dma.done.wait [#allocation3], 16  }
   0xd   :  { %824 = vsyncadd [#allocation3], 4294967280 }
   0xe   :  { %58 = sfence }
   0xf   :  { %v60_v0 = vld [vmem:[%s1005_s2] sm:$0xff]  ;;  %v61_v1 = vld [vmem:[%s1005_s2 + $0x8] sm:$0xff]  ;;  %v62_v2 = vld [vmem:[%s1005_s2 + $0x10] sm:$0xff]  ;;  %v826_v3 = vmov 0.0|0.0   ;;  %vm827_vm0 = vmmov 0   ;;  %v828_v6 = vmov 0.0  }
  0x10   :  { %779 = vmatprep.subr.bf16.mxu0 %v826_v3  ;;  %v780_v4 = vpack.c.bf16 %v61_v1, %v60_v0  ;;  %v63_v5 = vld [vmem:[%s1005_s2 + $0x18] sm:$0xff]  ;;  %738 = vmatprep.mubr.msk.f32.mxu0 %vm827_vm0, %v828_v6  ;;  %v64_v8 = vld [vmem:[%s1005_s2 + $0x20] sm:$0xff]  ;;  %v65_v9 = vld [vmem:[%s1005_s2 + $0x28] sm:$0xff]  ;;  %vm70_vm1 = vcmask 523264   ;;  %vm158_vm2 = vcmask 1046528   ;;  %vm829_vm3 = vmmov 1  }
  0x11   :  { %791 = vmatprep.subr.bf16.mxu1 %v826_v3  ;;  %745 = vmatprep.mubr.msk.f32.mxu1 %vm827_vm0, %v828_v6  ;;  %v783_v7 = vpack.c.bf16 %v63_v5, %v62_v2  ;;  %v786_v10 = vpack.c.bf16 %v65_v9, %v64_v8  ;;  %v66_v11 = vld [vmem:[%s1005_s2 + $0x30] sm:$0xff]  ;;  %v67_v12 = vld [vmem:[%s1005_s2 + $0x38] sm:$0xff]  ;;  %v59_v14 = vld [vmem:[%s1004_s1] sm:$0xff]  ;;  %s68_s1 = sld [smem:[#allocation2]]  ;;  %vm154_vm5 = vcmask 121856   ;;  %vm246_vm6 = vcmask 1043456  }
  0x12   :  { %781 = vmatpush3.bf16.msra.mxu0 %v780_v4  ;;  %v789_v13 = vpack.c.bf16 %v67_v12, %v66_v11  ;;  %v145_v15 = vld [vmem:[%s1006_s3] sm:$0xff]  ;;  %v146_v16 = vld [vmem:[%s1006_s3 + $0x8] sm:$0x7f]  ;;  %vm793_vm4 = vmpackc.low %vm158_vm2, %vm829_vm3  ;;  %vm242_vm7 = vcmask 162816   ;;  %vm334_vm8 = vcmask 1041408   ;;  %vm330_vm10 = vcmask 80896  }
  0x13   :  { %782 = vmatprep.subr.bf16.mxu0 %v826_v3  ;;  %v792_v17 = vpack.c.bf16 %v146_v16, %v145_v15  ;;  %v232_v19 = vld [vmem:[%s1008_s5] sm:$0xff]  ;;  %v233_v20 = vld [vmem:[%s1008_s5 + $0x8] sm:$0xff]  ;;  %v234_v26 = vld [vmem:[%s1008_s5 + $0x10] sm:$0xf]  ;;  %vm421_vm11 = vcmask 1044480   ;;  %vm417_vm12 = vcmask 39936  }
  0x14   :  { %v796_v24 = vpack.c.bf16 %v233_v20, %v232_v19  ;;  %v680_v27 = vld [vmem:[%s1007_s4] ss:$0 sm:$0xff]  ;;  %vm800_vm9 = vmpackc.low %vm334_vm8, %vm829_vm3  ;;  %v322_v32 = vld [vmem:[%s1010_s7 + $0x8] sm:$0x3]  ;;  %vm502_vm13 = vcmask 1042432   ;;  %vm498_vm14 = vcmask 23552  }
  0x15   :  { %794 = vmatpush3.bf16.msk.msra.mxu1 %vm793_vm4, %v792_v17  ;;  %v321_v31 = vld [vmem:[%s1010_s7] sm:$0xff] }
  0x16   :  { %784 = vmatpush3.bf16.msra.mxu0 %v783_v7  ;;  %795 = vmatprep.subr.bf16.mxu1 %v826_v3  ;;  %v799_v33 = vpack.c.bf16 %v322_v32, %v321_v31  ;;  %v683_v34 = vld [vmem:[%s1009_s6] ss:$0 sm:$0xff] }
  0x17   :  { %785 = vmatprep.subr.bf16.mxu0 %v826_v3  ;;  %v69_v18 = vstv %s68_s1  ;;  %v409_v39 = vld [vmem:[%s1012_s9] sm:$0x1f]  ;;  %s696_s1 = sld [smem:[#allocation2 + $0x1]] }
  0x18   :  { %v686_v40 = vld [vmem:[%s1011_s8] ss:$0 sm:$0xff] }
  0x19   :  { %v496_v45 = vld [vmem:[%s1014_s11] sm:$0x1f] }
  0x1a   :  { %787 = vmatpush3.bf16.msra.mxu0 %v786_v10  ;;  %v497_v46 = vld [vmem:[%s1015_s12] sm:$0x7] }
  0x1b   :  { %788 = vmatprep.subr.bf16.mxu0 %v826_v3  ;;  %v689_v47 = vld [vmem:[%s1013_s10] ss:$0 sm:$0xff] }
  0x1d   :  { %v650_v55 = vstv %s696_s1 }
  0x1e   :  { %790 = vmatpush3.bf16.msra.mxu0 %v789_v13 }
  0x1f   :  { %769 = vmatprep.subr.mxu0 %v828_v6 }
  0x21   :  { %739 = vmatmul.mubr.msk.f32.vlgmr.msra.gmra.mrb[0].mxu0 %vm70_vm1, %v59_v14 }
  0x22   :  { %771 = vmatprep.mubr.msk.f32.mxu0 %vm827_vm0, %v828_v6  ;;  %770 = vmatpush3.msk.msra.mxu0 %vm502_vm13, %v497_v46 }
  0xf4   :  { %v140_v21 = vpop.f32.mrb[0].mxu0 }
  0xf5   :  { %v141_v22 = vadd.f32 %v140_v21, %v69_v18  ;;  %v740_v23 = vpop.f32.mrb[1].mxu0 }
  0xf7   :  { %v144_v25 = vmax.f32 %v141_v22, 0.0 }
  0xf9   :  { %746 = vmatmul.mubr.msk.f32.vlgmr.msra.gmra.mrb[0].mxu1 %vm154_vm5, %v144_v25 }
  0xfa   :  { %797 = vmatpush3.bf16.msra.mxu1 %v796_v24  ;;  %754 = vmatprep.mubr.msk.f32.mxu1 %vm827_vm0, %v828_v6 }
  0xfb   :  { %752 = vmatprep.subr.mxu1 %v828_v6 }
  0xfe   :  { %753 = vmatpush3.msk.msra.mxu1 %vm246_vm6, %v234_v26 }
  0xff   :  { %798 = vmatprep.subr.bf16.mxu1 %v826_v3 }
 0x1cc   :  { %v228_v28 = vpop.f32.mrb[0].mxu1 }
 0x1cd   :  { %v229_v29 = vadd.f32 %v680_v27, %v228_v28  ;;  %v747_v30 = vpop.f32.mrb[1].mxu1 }
 0x1cf   :  { %755 = vmatmul.mubr.msk.f32.vlgmr.msra.gmra.mrb[2].mxu1 %vm242_vm7, %v229_v29 }
 0x1d0   :  { %761 = vmatprep.mubr.msk.f32.mxu1 %vm827_vm0, %v828_v6  ;;  %801 = vmatpush3.bf16.msk.msra.mxu1 %vm800_vm9, %v799_v33 }
 0x1d1   :  { %764 = vmatprep.subr.mxu1 %v828_v6 }
 0x2a2   :  { %v316_v35 = vpop.f32.mrb[2].mxu1 }
 0x2a3   :  { %v317_v36 = vadd.f32 %v683_v34, %v316_v35  ;;  %v756_v37 = vpop.f32.mrb[3].mxu1 }
 0x2a5   :  { %v320_v38 = vmax.f32 %v317_v36, 0.0 }
 0x2a7   :  { %762 = vmatmul.mubr.msk.f32.vlgmr.msra.gmra.mrb[4].mxu1 %vm330_vm10, %v320_v38 }
 0x2a8   :  { %766 = vmatprep.mubr.msk.f32.mxu1 %vm827_vm0, %v828_v6  ;;  %765 = vmatpush3.msk.msra.mxu1 %vm421_vm11, %v409_v39 }
 0x2a9   :  { %774 = vmatprep.subr.mxu1 %v828_v6 }
 0x37a   :  { %v404_v41 = vpop.f32.mrb[4].mxu1 }
 0x37b   :  { %v405_v42 = vadd.f32 %v686_v40, %v404_v41  ;;  %v763_v43 = vpop.f32.mrb[5].mxu1 }
 0x37d   :  { %v408_v44 = vmax.f32 %v405_v42, 0.0 }
 0x37f   :  { %767 = vmatmul.mubr.msk.f32.vlgmr.msra.gmra.mrb[6].mxu1 %vm417_vm12, %v408_v44 }
 0x380   :  { %775 = vmatpush3.msk.msra.mxu1 %vm421_vm11, %v496_v45  ;;  %776 = vmatprep.mubr.msk.f32.mxu1 %vm827_vm0, %v828_v6  ;;  %vm668_vm0 = vcmask 7168  }
 0x383   :  { %777 = vmatmul.mubr.msk.f32.vlgmr.msra.gmra.mrb[8].mxu1 %vm417_vm12, %v408_v44 }
 0x452   :  { %v491_v48 = vpop.f32.mrb[6].mxu1 }
 0x453   :  { %v492_v49 = vadd.f32 %v689_v47, %v491_v48  ;;  %v768_v50 = vpop.f32.mrb[7].mxu1 }
 0x455   :  { %v495_v51 = vmax.f32 %v492_v49, 0.0 }
 0x456   :  { %v645_v52 = vpop.f32.mrb[8].mxu1 }
 0x457   :  { %667 = vst.msk [vmem:[%s1016_s13] sm:$0xff] %vm498_vm14, %v495_v51  ;;  %772 = vmatmul.mubr.msk.f32.vlgmr.msra.gmra.mrb[2].mxu0 %vm498_vm14, %v495_v51  ;;  %v778_v53 = vpop.f32.mrb[9].mxu1 }
 0x52a   :  { %v572_v54 = vpop.f32.mrb[2].mxu0 }
 0x52b   :  { %v646_v56 = vadd.f32 %v645_v52, %v572_v54  ;;  %v773_v57 = vpop.f32.mrb[3].mxu0 }
 0x52d   :  { %v651_v58 = vadd.f32 %v650_v55, %v646_v56 }
 0x52f   :  { %v653_v59 = vand.u32 2147483647, %v651_v58  ;;  %v652_v6 = vmax.f32 %v651_v58, 0.0 }
 0x531   :  { %v654_v60 = vsub.f32 0.0, %v653_v59 }
 0x533   :  { %v655_v61 = vmul.f32 1.442695, %v654_v60 }
 0x535   :  { %807 = vpow2.f32 %v655_v61 }
 0x53f   :  { %v808_v62 = vpop.eup %807 }
 0x540   :  { %v657_v63 = vadd.f32 1.0, %v808_v62  ;;  %v660_v0 = vmul.f32 -0.5, %v808_v62  ;;  %v663_v2 = vand.u32 2147483647, %v808_v62 }
 0x542   :  { %809 = vlog2.f32 %v657_v63  ;;  %v661_v1 = vadd.f32 1.0, %v660_v0  ;;  %vm664_vm15 = vcmp.lt.f32.partialorder %v663_v2, 0.0004427343 }
 0x544   :  { %v662_v5 = vmul.f32 %v808_v62, %v661_v1 }
 0x54c   :  { %v810_v3 = vpop.eup %809 }
 0x54d   :  { %v659_v4 = vmul.f32 0.6931472, %v810_v3 }
 0x54f   :  { %v665_v7 = vsel %vm664_vm15, %v662_v5, %v659_v4 }
 0x550   :  { %v666_v8 = vadd.f32 %v665_v7, %v652_v6 }
 0x552   :  { %669 = vst.msk [vmem:[%s1017_s14] sm:$0xff] %vm668_vm0, %v666_v8 }
 0x553   :  { %678 = vsyncpa [#allocation3], 1 }

</bundles_post_ra>
